<compile_context>
chip_gen: v7x
topology: tpu7x:2x2x1
jax: 0.10.0
libtpu: 0.0.40
codegen_flags: <defaults>
</compile_context>

<pallas_src>
import functools

import jax
import jax.numpy as jnp
from jax import lax
from jax.experimental import pallas as pl
from jax.experimental.pallas import tpu as pltpu


def _round_up(n, m):
    return ((n + m - 1) // m) * m


def _projection_head_kernel(x_ref, w1_ref, b1_ref, w2_ref, b2_ref,
                            gamma_ref, beta_ref, o_ref, *, eps, matmul_dtype):
    x = x_ref[...]                                   # [TM, E]  f32

    # projected = Linear(embedding_dim, projection_dim)(x)   (MXU, f32 accumulate)
    projected = jnp.dot(x.astype(matmul_dtype), w1_ref[...].astype(matmul_dtype),
                        preferred_element_type=jnp.float32) + b1_ref[...]   # [TM, P]

    # Exact (erf-based) GELU, matching torch.nn.GELU() default numerics.
    inv_sqrt2 = jnp.float32(0.7071067811865476)
    h = 0.5 * projected * (1.0 + lax.erf(projected * inv_sqrt2))

    # fc = Linear(projection_dim, projection_dim)
    y = jnp.dot(h.astype(matmul_dtype), w2_ref[...].astype(matmul_dtype),
                preferred_element_type=jnp.float32) + b2_ref[...]           # [TM, P]

    # dropout: identity at inference; residual add.
    y = y + projected

    # LayerNorm over the last dim — one-pass statistics (sum & sum of squares).
    p = y.shape[-1]
    inv_p = jnp.float32(1.0 / p)
    s = jnp.sum(y, axis=-1, keepdims=True)
    s2 = jnp.sum(y * y, axis=-1, keepdims=True)
    mean = s * inv_p
    var = jnp.maximum(s2 * inv_p - mean * mean, 0.0)   # guard tiny negative
    normed = (y - mean) * lax.rsqrt(var + jnp.float32(eps))
    o_ref[...] = (normed * gamma_ref[...] + beta_ref[...]).astype(o_ref.dtype)


def projection_head(x, w1, b1, w2, b2, gamma, beta, *,
                    eps=1e-5, block_rows=256, matmul_dtype=jnp.float32):
    """x: [B, E] f32, w1: [E, P], b1: [1, P], w2: [P, P], b2: [1, P],
    gamma/beta: [1, P]. Returns [B, P] f32."""
    B, E = x.shape
    P = w1.shape[1]

    # Batch tile: multiple of 8 (f32 sublane), capped at block_rows, not larger
    # than the (padded) batch. Zero-pad B so the grid divides evenly; padded rows
    # are independent per-row work and get sliced off below.
    tm = min(_round_up(block_rows, 8), _round_up(B, 8))
    B_pad = _round_up(B, tm)
    if B_pad != B:
        x = jnp.pad(x, ((0, B_pad - B), (0, 0)))
    grid = (pl.cdiv(B_pad, tm),)

    # VMEM budget: double-buffered batch tiles + resident weights (counted x2 for
    # headroom). Only raise the scoped limit when the default (16/32 MiB) is tight,
    # and stay well under v7x's 64 MiB physical VMEM.
    est_bytes = 2 * 4 * (tm * E + tm * P) + 2 * 4 * (E * P + P * P + 4 * P)
    cp_kwargs = {"dimension_semantics": ("parallel",)}
    if est_bytes > (16 << 20):
        cp_kwargs["vmem_limit_bytes"] = min(int(est_bytes * 1.5), 60 * 1024 * 1024)
    compiler_params = pltpu.CompilerParams(**cp_kwargs)

    const = lambda i: (0, 0)   # weights / LN params: resident, never re-fetched
    out_pad = pl.pallas_call(
        functools.partial(_projection_head_kernel, eps=eps, matmul_dtype=matmul_dtype),
        out_shape=jax.ShapeDtypeStruct((B_pad, P), jnp.float32),
        grid=grid,
        in_specs=[
            pl.BlockSpec((tm, E), lambda i: (i, 0)),   # x: streamed per batch tile
            pl.BlockSpec((E, P), const),               # w1
            pl.BlockSpec((1, P), const),               # b1
            pl.BlockSpec((P, P), const),               # w2
            pl.BlockSpec((1, P), const),               # b2
            pl.BlockSpec((1, P), const),               # gamma
            pl.BlockSpec((1, P), const),               # beta
        ],
        out_specs=pl.BlockSpec((tm, P), lambda i: (i, 0)),
        compiler_params=compiler_params,
    )(x, w1, b1, w2, b2, gamma, beta)

    return out_pad[:B] if B_pad != B else out_pad


if __name__ == "__main__":
    B = 8            # batch
    E = 32           # embedding_dim
    P = 128          # projection_dim (keep a multiple of 128 for lane-dense stores)

    key = jax.random.PRNGKey(0)
    kx, k1, kb1, k2, kb2 = jax.random.split(key, 5)

    x = jax.random.normal(kx, (B, E), dtype=jnp.float32)

    # Deterministic synthetic parameters (shapes match nn.Linear / nn.LayerNorm).
    # nn.Linear(E, P).weight is [P, E]; we store the transpose [E, P] for x @ W.
    w1 = jax.random.normal(k1, (E, P), dtype=jnp.float32) * 0.05
    b1 = jax.random.normal(kb1, (1, P), dtype=jnp.float32) * 0.05
    w2 = jax.random.normal(k2, (P, P), dtype=jnp.float32) * 0.05
    b2 = jax.random.normal(kb2, (1, P), dtype=jnp.float32) * 0.05
    gamma = jnp.ones((1, P), dtype=jnp.float32)   # LayerNorm weight
    beta = jnp.zeros((1, P), dtype=jnp.float32)   # LayerNorm bias

    out = projection_head(x, w1, b1, w2, b2, gamma, beta)
    out = jax.block_until_ready(out)

    # Cross-check against a pure-JAX reference of the same math.
    proj_ref = x @ w1 + b1
    h_ref = 0.5 * proj_ref * (1.0 + lax.erf(proj_ref / jnp.sqrt(2.0)))
    y_ref = h_ref @ w2 + b2 + proj_ref
    mu = y_ref.mean(-1, keepdims=True)
    var = ((y_ref - mu) ** 2).mean(-1, keepdims=True)
    ref = (y_ref - mu) * lax.rsqrt(var + 1e-5) * gamma + beta
    assert out.shape == (B, P)
    assert jnp.allclose(out, ref, atol=1e-4, rtol=1e-4), "mismatch vs reference"

    print("KERNEL_OK")
</pallas_src>

<mosaic_0001>
module attributes {stable_mosaic.version = 11 : i64} {
  func.func @_projection_head_kernel(%arg0: i32, %arg1: memref<8x32xf32, #tpu.memory_space<vmem>>, %arg2: memref<32x128xf32, #tpu.memory_space<vmem>>, %arg3: memref<1x128xf32, #tpu.memory_space<vmem>>, %arg4: memref<128x128xf32, #tpu.memory_space<vmem>>, %arg5: memref<1x128xf32, #tpu.memory_space<vmem>>, %arg6: memref<1x128xf32, #tpu.memory_space<vmem>>, %arg7: memref<1x128xf32, #tpu.memory_space<vmem>>, %arg8: memref<8x128xf32, #tpu.memory_space<vmem>>) attributes {dimension_semantics = [#tpu.dimension_semantics<parallel>], iteration_bounds = array<i64: 1>, scalar_prefetch = 0 : i64, scratch_operands = 0 : i64, tpu.core_type = #tpu.core_type<tc>, window_params = [{transform_indices = @transform_0, window_bounds = array<i64: 8, 32>}, {pipeline_mode = #tpu.pipeline_mode<synchronous>, transform_indices = @transform_1, window_bounds = array<i64: 32, 128>}, {pipeline_mode = #tpu.pipeline_mode<synchronous>, transform_indices = @transform_2, window_bounds = array<i64: 1, 128>}, {pipeline_mode = #tpu.pipeline_mode<synchronous>, transform_indices = @transform_3, window_bounds = array<i64: 128, 128>}, {pipeline_mode = #tpu.pipeline_mode<synchronous>, transform_indices = @transform_4, window_bounds = array<i64: 1, 128>}, {pipeline_mode = #tpu.pipeline_mode<synchronous>, transform_indices = @transform_5, window_bounds = array<i64: 1, 128>}, {pipeline_mode = #tpu.pipeline_mode<synchronous>, transform_indices = @transform_6, window_bounds = array<i64: 1, 128>}, {transform_indices = @transform_7, window_bounds = array<i64: 8, 128>}]} {
    %c0 = arith.constant 0 : index
    %c0_0 = arith.constant 0 : index
    %0 = vector.load %arg1[%c0, %c0_0] : memref<8x32xf32, #tpu.memory_space<vmem>>, vector<8x32xf32>
    %c0_1 = arith.constant 0 : index
    %c0_2 = arith.constant 0 : index
    %1 = vector.load %arg2[%c0_1, %c0_2] : memref<32x128xf32, #tpu.memory_space<vmem>>, vector<32x128xf32>
    %cst = arith.constant dense<0.000000e+00> : vector<8x128xf32>
    %2 = tpu.matmul %0, %1, %cst {dimension_numbers = #tpu.dot_dimension_numbers<[1], [0], [0], [1], [0, 0, 1, 1], [], []>} : vector<8x32xf32>, vector<32x128xf32>, vector<8x128xf32> -> vector<8x128xf32>
    %c0_3 = arith.constant 0 : index
    %c0_4 = arith.constant 0 : index
    %3 = vector.load %arg3[%c0_3, %c0_4] : memref<1x128xf32, #tpu.memory_space<vmem>>, vector<1x128xf32>
    %4 = vector.broadcast %3 : vector<1x128xf32> to vector<8x128xf32>
    %5 = arith.addf %2, %4 : vector<8x128xf32>
    %cst_5 = arith.constant 5.000000e-01 : f32
    %6 = vector.broadcast %cst_5 : f32 to vector<8x128xf32>
    %7 = arith.mulf %6, %5 : vector<8x128xf32>
    %cst_6 = arith.constant 0.707106769 : f32
    %8 = vector.broadcast %cst_6 : f32 to vector<8x128xf32>
    %9 = arith.mulf %5, %8 : vector<8x128xf32>
    %10 = math.erf %9 : vector<8x128xf32>
    %cst_7 = arith.constant 1.000000e+00 : f32
    %11 = vector.broadcast %cst_7 : f32 to vector<8x128xf32>
    %12 = arith.addf %11, %10 : vector<8x128xf32>
    %13 = arith.mulf %7, %12 : vector<8x128xf32>
    %c0_8 = arith.constant 0 : index
    %c0_9 = arith.constant 0 : index
    %14 = vector.load %arg4[%c0_8, %c0_9] : memref<128x128xf32, #tpu.memory_space<vmem>>, vector<128x128xf32>
    %cst_10 = arith.constant dense<0.000000e+00> : vector<8x128xf32>
    %15 = tpu.matmul %13, %14, %cst_10 {dimension_numbers = #tpu.dot_dimension_numbers<[1], [0], [0], [1], [0, 0, 1, 1], [], []>} : vector<8x128xf32>, vector<128x128xf32>, vector<8x128xf32> -> vector<8x128xf32>
    %c0_11 = arith.constant 0 : index
    %c0_12 = arith.constant 0 : index
    %16 = vector.load %arg5[%c0_11, %c0_12] : memref<1x128xf32, #tpu.memory_space<vmem>>, vector<1x128xf32>
    %17 = vector.broadcast %16 : vector<1x128xf32> to vector<8x128xf32>
    %18 = arith.addf %15, %17 : vector<8x128xf32>
    %19 = arith.addf %18, %5 : vector<8x128xf32>
    %cst_13 = arith.constant dense<0.000000e+00> : vector<8xf32>
    %20 = vector.multi_reduction <add>, %19, %cst_13 [1] : vector<8x128xf32> to vector<8xf32>
    %21 = vector.shape_cast %20 : vector<8xf32> to vector<8x1xf32>
    %22 = arith.mulf %19, %19 : vector<8x128xf32>
    %cst_14 = arith.constant dense<0.000000e+00> : vector<8xf32>
    %23 = vector.multi_reduction <add>, %22, %cst_14 [1] : vector<8x128xf32> to vector<8xf32>
    %24 = vector.shape_cast %23 : vector<8xf32> to vector<8x1xf32>
    %cst_15 = arith.constant 7.812500e-03 : f32
    %25 = vector.broadcast %cst_15 : f32 to vector<8x1xf32>
    %26 = arith.mulf %21, %25 : vector<8x1xf32>
    %cst_16 = arith.constant 7.812500e-03 : f32
    %27 = vector.broadcast %cst_16 : f32 to vector<8x1xf32>
    %28 = arith.mulf %24, %27 : vector<8x1xf32>
    %29 = arith.mulf %26, %26 : vector<8x1xf32>
    %30 = arith.subf %28, %29 : vector<8x1xf32>
    %cst_17 = arith.constant 0.000000e+00 : f32
    %31 = vector.broadcast %cst_17 : f32 to vector<8x1xf32>
    %32 = arith.maximumf %30, %31 : vector<8x1xf32>
    %33 = vector.broadcast %26 : vector<8x1xf32> to vector<8x128xf32>
    %34 = arith.subf %19, %33 : vector<8x128xf32>
    %cst_18 = arith.constant 9.99999974E-6 : f32
    %35 = vector.broadcast %cst_18 : f32 to vector<8x1xf32>
    %36 = arith.addf %32, %35 : vector<8x1xf32>
    %37 = math.rsqrt %36 : vector<8x1xf32>
    %38 = vector.broadcast %37 : vector<8x1xf32> to vector<8x128xf32>
    %39 = arith.mulf %34, %38 : vector<8x128xf32>
    %c0_19 = arith.constant 0 : index
    %c0_20 = arith.constant 0 : index
    %40 = vector.load %arg6[%c0_19, %c0_20] : memref<1x128xf32, #tpu.memory_space<vmem>>, vector<1x128xf32>
    %41 = vector.broadcast %40 : vector<1x128xf32> to vector<8x128xf32>
    %42 = arith.mulf %39, %41 : vector<8x128xf32>
    %c0_21 = arith.constant 0 : index
    %c0_22 = arith.constant 0 : index
    %43 = vector.load %arg7[%c0_21, %c0_22] : memref<1x128xf32, #tpu.memory_space<vmem>>, vector<1x128xf32>
    %44 = vector.broadcast %43 : vector<1x128xf32> to vector<8x128xf32>
    %45 = arith.addf %42, %44 : vector<8x128xf32>
    %c0_23 = arith.constant 0 : index
    %c0_24 = arith.constant 0 : index
    %46 = vector.load %arg8[%c0_23, %c0_24] : memref<8x128xf32, #tpu.memory_space<vmem>>, vector<8x128xf32>
    tpu.vector_store %arg8[%c0_23, %c0_24], %45 {strides = array<i32>} : memref<8x128xf32, #tpu.memory_space<vmem>>, vector<8x128xf32>,
    return
  }
  func.func @transform_0(%arg0: i32) -> (i32, i32) {
    %c0_i32 = arith.constant 0 : i32
    %c0_i32_0 = arith.constant 0 : i32
    return %arg0, %c0_i32 : i32, i32
  }
  func.func @transform_1(%arg0: i32) -> (i32, i32) {
    %c0_i32 = arith.constant 0 : i32
    %c0_i32_0 = arith.constant 0 : i32
    %c0_i32_1 = arith.constant 0 : i32
    return %c0_i32, %c0_i32_0 : i32, i32
  }
  func.func @transform_2(%arg0: i32) -> (i32, i32) {
    %c0_i32 = arith.constant 0 : i32
    %c0_i32_0 = arith.constant 0 : i32
    %c0_i32_1 = arith.constant 0 : i32
    return %c0_i32, %c0_i32_0 : i32, i32
  }
  func.func @transform_3(%arg0: i32) -> (i32, i32) {
    %c0_i32 = arith.constant 0 : i32
    %c0_i32_0 = arith.constant 0 : i32
    %c0_i32_1 = arith.constant 0 : i32
    return %c0_i32, %c0_i32_0 : i32, i32
  }
  func.func @transform_4(%arg0: i32) -> (i32, i32) {
    %c0_i32 = arith.constant 0 : i32
    %c0_i32_0 = arith.constant 0 : i32
    %c0_i32_1 = arith.constant 0 : i32
    return %c0_i32, %c0_i32_0 : i32, i32
  }
  func.func @transform_5(%arg0: i32) -> (i32, i32) {
    %c0_i32 = arith.constant 0 : i32
    %c0_i32_0 = arith.constant 0 : i32
    %c0_i32_1 = arith.constant 0 : i32
    return %c0_i32, %c0_i32_0 : i32, i32
  }
  func.func @transform_6(%arg0: i32) -> (i32, i32) {
    %c0_i32 = arith.constant 0 : i32
    %c0_i32_0 = arith.constant 0 : i32
    %c0_i32_1 = arith.constant 0 : i32
    return %c0_i32, %c0_i32_0 : i32, i32
  }
  func.func @transform_7(%arg0: i32) -> (i32, i32) {
    %c0_i32 = arith.constant 0 : i32
    %c0_i32_0 = arith.constant 0 : i32
    return %arg0, %c0_i32 : i32, i32
  }
}

</mosaic_0001>

<bundles_post_ra>
// kernel: tpu_custom_call.1
= control target key start
LH: loop header
LB: loop body
LE: loop exit
PB: predicated region body
PF: predicated region fallthrough
CT: control target
= control target key end

     0   :  { %12 = vsyncpa [#allocation3], 0  ;;  %s623_s0 = inlined_call_operand.hbm [shape: f32[8,32], index: 0, kind: input, shape index: {}]   ;;  %s624_s1 = inlined_call_operand.hbm [shape: f32[32,128], index: 1, kind: input, shape index: {}]   ;;  %s625_s2 = inlined_call_operand.vmem [shape: f32[1,128], index: 2, kind: input, shape index: {}]   ;;  %s626_s3 = inlined_call_operand.hbm [shape: f32[128,128], index: 3, kind: input, shape index: {}]   ;;  %s627_s4 = inlined_call_operand.vmem [shape: f32[1,128], index: 4, kind: input, shape index: {}]   ;;  %s628_s5 = inlined_call_operand.vmem [shape: f32[1,128], index: 5, kind: input, shape index: {}]   ;;  %s629_s6 = inlined_call_operand.vmem [shape: f32[1,128], index: 6, kind: input, shape index: {}]   ;;  %s630_s7 = inlined_call_operand.hbm [shape: f32[8,128], index: 7, kind: output, shape index: {}]  }
   0x1   :  { %13 = vsyncpa [#allocation6], 0 }
   0x2   :  { %14 = vsyncpa [#allocation4], 0  ;;  %s508_s24 = smov [#allocation5]   ;;  %s414_s28 = scalar_lea.hbm %s624_s1, 512 }
   0x3   :  { %s30_s25 = sshll.u32 %s508_s24, 4  ;;  %p415_p0 = scmp.ne.s32.totalorder %s624_s1, %s414_s28  ;;  %s31_s25 = int_to_ptr.vmem [resolvable:$true] %s30_s25 }
   0x4   :  { %p418_p1 = scmp.lt.u32.totalorder %s414_s28, %s624_s1 }
   0x6   :  { %p420_p2 = pnand %p418_p1, %p415_p0 }
   0x8   :  { %423 = shalt.err (!%p420_p2)
}
   0x9   :  { %s424_s10 = scalar_lea.vmem %s31_s25, 512  ;;  %p429_p4 = scmp.lt.s32.totalorder %s31_s25, %s31_s25 }
   0xa   :  { %p425_p3 = scmp.ne.s32.totalorder %s31_s25, %s424_s10  ;;  %p430_p5 = scmp.lt.s32.totalorder %s424_s10, %s424_s10 }
   0xc   :  { %p431_p6 = por %p430_p5, %p429_p4 }
   0xe   :  { %p432_p7 = pnand %p431_p6, %p425_p3 }
  0x10   :  { %435 = shalt.err (!%p432_p7)
}
  0x11   :  { %s509_s11 = smov 128   ;;  %s510_s12 = smov 8  }
  0x12   :  { %36 = dma.hbm_to_vmem [thread:$0]  %s624_s1, 512, %s31_s25, [#allocation6], %s509_s11, %s509_s11, %s510_s12  }
  0x13   :  { %s511_s15 = smov [#allocation2]   ;;  %s512_s17 = smov [#allocation7]  }
  0x14   :  { %s21_s16 = sshll.u32 %s511_s15, 4  ;;  %s44_s18 = sshll.u32 %s512_s17, 4  ;;  %s22_s16 = int_to_ptr.vmem [resolvable:$true] %s21_s16  ;;  %s45_s18 = int_to_ptr.vmem [resolvable:$true] %s44_s18 }
  0x15   :  { %s436_s21 = scalar_lea.hbm %s623_s0, 128 }
  0x16   :  { %p437_p8 = scmp.ne.s32.totalorder %s623_s0, %s436_s21  ;;  %p440_p9 = scmp.lt.u32.totalorder %s436_s21, %s623_s0 }
  0x18   :  { %p442_p10 = pnand %p440_p9, %p437_p8 }
  0x1a   :  { %445 = shalt.err (!%p442_p10)
}
  0x1b   :  { %s446_s1 = scalar_lea.vmem %s22_s16, 128  ;;  %p451_p12 = scmp.lt.s32.totalorder %s22_s16, %s22_s16 }
  0x1c   :  { %p447_p11 = scmp.ne.s32.totalorder %s22_s16, %s446_s1  ;;  %p452_p13 = scmp.lt.s32.totalorder %s446_s1, %s446_s1 }
  0x1e   :  { %p453_p0 = por %p452_p13, %p451_p12 }
  0x20   :  { %p454_p1 = pnand %p453_p0, %p447_p11 }
  0x22   :  { %457 = shalt.err (!%p454_p1)
}
  0x23   :  { %24 = dma.hbm_to_vmem [thread:$0]  %s623_s0, 128, %s22_s16, [#allocation3]  }
  0x24   :  { %s458_s30 = scalar_lea.hbm %s626_s3, 2048 }
  0x25   :  { %p459_p2 = scmp.ne.s32.totalorder %s626_s3, %s458_s30  ;;  %p462_p3 = scmp.lt.u32.totalorder %s458_s30, %s626_s3 }
  0x27   :  { %p464_p4 = pnand %p462_p3, %p459_p2 }
  0x29   :  { %467 = shalt.err (!%p464_p4)
}
  0x2a   :  { %s468_s14 = scalar_lea.vmem %s45_s18, 2048  ;;  %p473_p6 = scmp.lt.s32.totalorder %s45_s18, %s45_s18 }
  0x2b   :  { %p469_p5 = scmp.ne.s32.totalorder %s45_s18, %s468_s14  ;;  %p474_p7 = scmp.lt.s32.totalorder %s468_s14, %s468_s14 }
  0x2d   :  { %p475_p8 = por %p474_p7, %p473_p6 }
  0x2f   :  { %p476_p9 = pnand %p475_p8, %p469_p5 }
  0x31   :  { %479 = shalt.err (!%p476_p9)
}
  0x32   :  { %50 = dma.hbm_to_vmem [thread:$0]  %s626_s3, 2048, %s45_s18, [#allocation6], %s509_s11, %s509_s11, %s510_s12  }
  0x33   :  { %502 = dma.done.wait [#allocation3], 128  }
  0x34   :  { %503 = vsyncadd [#allocation3], 4294967168 }
  0x35   :  { %504 = dma.done.wait [#allocation6], 2560  }
  0x36   :  { %505 = vsyncadd [#allocation6], 4294964736  ;;  %v513_v0 = vmov 0.0|0.0   ;;  %vm514_vm0 = vmmov 0   ;;  %v515_v1 = vmov 0.0   ;;  %v67_v2 = vld [vmem:[#allocation5] sm:$0xff] }
  0x37   :  { %371 = vmatprep.subr.bf16.mxu0 %v513_v0  ;;  %333 = vmatprep.mubr.msk.f32.mxu0 %vm514_vm0, %v515_v1  ;;  %v68_v3 = vld [vmem:[#allocation5 + $0x8] sm:$0xff]  ;;  %v69_v4 = vld [vmem:[#allocation5 + $0x10] sm:$0xff]  ;;  %v70_v6 = vld [vmem:[#allocation5 + $0x18] sm:$0xff]  ;;  %vm78_vm1 = vcmask 261120   ;;  %s516_s19 = smov [#allocation8]  }
  0x38   :  { %377 = vmatprep.subr.bf16.mxu1 %v513_v0  ;;  %368 = vmatprep.mubr.msk.f32.mxu1 %vm514_vm0, %v515_v1  ;;  %v372_v5 = vpack.c.bf16 %v68_v3, %v67_v2  ;;  %v157_v7 = vld [vmem:[#allocation7] sm:$0xff]  ;;  %v158_v8 = vld [vmem:[#allocation7 + $0x8] sm:$0xff]  ;;  %v159_v9 = vld [vmem:[#allocation7 + $0x10] sm:$0xff]  ;;  %v375_v11 = vpack.c.bf16 %v70_v6, %v69_v4  ;;  %s288_s20 = sshll.u32 %s516_s19, 4  ;;  %s289_s20 = int_to_ptr.vmem [resolvable:$true] %s288_s20 }
  0x39   :  { %v160_v10 = vld [vmem:[#allocation7 + $0x18] sm:$0xff]  ;;  %v378_v12 = vpack.c.bf16 %v158_v8, %v157_v7  ;;  %v161_v14 = vld [vmem:[#allocation7 + $0x20] sm:$0xff]  ;;  %v162_v15 = vld [vmem:[#allocation7 + $0x28] sm:$0xff]  ;;  %s480_s21 = scalar_lea.vmem %s289_s20, 128  ;;  %p485_p11 = scmp.lt.s32.totalorder %s289_s20, %s289_s20 }
  0x3a   :  { %373 = vmatpush3.bf16.msra.mxu0 %v372_v5  ;;  %v381_v13 = vpack.c.bf16 %v160_v10, %v159_v9  ;;  %v66_v16 = vld [vmem:[#allocation2] sm:$0xff]  ;;  %v384_v17 = vpack.c.bf16 %v162_v15, %v161_v14  ;;  %v163_v18 = vld [vmem:[#allocation7 + $0x30] sm:$0xff]  ;;  %v165_v21 = vld [vmem:[#allocation7 + $0x40] sm:$0xff]  ;;  %p481_p10 = scmp.ne.s32.totalorder %s289_s20, %s480_s21  ;;  %p486_p12 = scmp.lt.s32.totalorder %s480_s21, %s480_s21 }
  0x3b   :  { %374 = vmatprep.subr.bf16.mxu0 %v513_v0  ;;  %379 = vmatpush3.bf16.msra.mxu1 %v378_v12  ;;  %v164_v19 = vld [vmem:[#allocation7 + $0x38] sm:$0xff]  ;;  %v166_v22 = vld [vmem:[#allocation7 + $0x48] sm:$0xff]  ;;  %v167_v24 = vld [vmem:[#allocation7 + $0x50] sm:$0xff] }
  0x3c   :  { %380 = vmatprep.subr.bf16.mxu1 %v513_v0  ;;  %v387_v20 = vpack.c.bf16 %v164_v19, %v163_v18  ;;  %v390_v23 = vpack.c.bf16 %v166_v22, %v165_v21  ;;  %v168_v25 = vld [vmem:[#allocation7 + $0x58] sm:$0xff]  ;;  %v169_v27 = vld [vmem:[#allocation7 + $0x60] sm:$0xff]  ;;  %v170_v28 = vld [vmem:[#allocation7 + $0x68] sm:$0xff]  ;;  %p487_p13 = por %p486_p12, %p485_p11 }
  0x3d   :  { %v393_v26 = vpack.c.bf16 %v168_v25, %v167_v24  ;;  %v396_v29 = vpack.c.bf16 %v170_v28, %v169_v27  ;;  %v171_v30 = vld [vmem:[#allocation7 + $0x70] sm:$0xff]  ;;  %v172_v31 = vld [vmem:[#allocation7 + $0x78] sm:$0xff] }
  0x3e   :  { %376 = vmatpush3.bf16.msra.mxu0 %v375_v11  ;;  %v399_v32 = vpack.c.bf16 %v172_v31, %v171_v30  ;;  %v298_v33 = vld [vmem:[%s625_s2] ss:$0 sm:$0xff]  ;;  %p488_p0 = pnand %p487_p13, %p481_p10 }
  0x3f   :  { %382 = vmatpush3.bf16.msra.mxu1 %v381_v13  ;;  %v300_v42 = vld [vmem:[%s627_s4] ss:$0 sm:$0xff] }
  0x40   :  { %383 = vmatprep.subr.bf16.mxu1 %v513_v0  ;;  %v301_v58 = vld [vmem:[%s628_s5] ss:$0 sm:$0xff] }
  0x41   :  { %334 = vmatmul.mubr.msk.f32.vlgmr.msra.gmra.mrb[0].mxu0 %vm78_vm1, %v66_v16  ;;  %v302_v60 = vld [vmem:[%s629_s6] ss:$0 sm:$0xff] }
  0x43   :  { %385 = vmatpush3.bf16.msra.mxu1 %v384_v17 }
  0x44   :  { %386 = vmatprep.subr.bf16.mxu1 %v513_v0 }
  0x47   :  { %388 = vmatpush3.bf16.msra.mxu1 %v387_v20 }
  0x48   :  { %389 = vmatprep.subr.bf16.mxu1 %v513_v0 }
  0x4b   :  { %391 = vmatpush3.bf16.msra.mxu1 %v390_v23 }
  0x4c   :  { %392 = vmatprep.subr.bf16.mxu1 %v513_v0 }
  0x4f   :  { %394 = vmatpush3.bf16.msra.mxu1 %v393_v26 }
  0x50   :  { %395 = vmatprep.subr.bf16.mxu1 %v513_v0 }
  0x53   :  { %397 = vmatpush3.bf16.msra.mxu1 %v396_v29 }
  0x54   :  { %398 = vmatprep.subr.bf16.mxu1 %v513_v0 }
  0x57   :  { %400 = vmatpush3.bf16.msra.mxu1 %v399_v32 }
 0x114   :  { %v148_v34 = vpop.f32.mrb[0].mxu0 }
 0x115   :  { %v149_v35 = vadd.f32 %v298_v33, %v148_v34  ;;  %v335_v36 = vpop.f32.mrb[1].mxu0 }
 0x117   :  { %v153_v37 = vmul.f32 0.70710677, %v149_v35  ;;  %v152_v39 = vmul.f32 0.5, %v149_v35 }
 0x119   :  { %410 = verf.f32 %v153_v37 }
 0x123   :  { %v411_v38 = vpop.eup %410 }
 0x124   :  { %v155_v40 = vadd.f32 1.0, %v411_v38 }
 0x126   :  { %v156_v41 = vmul.f32 %v155_v40, %v152_v39 }
 0x128   :  { %369 = vmatmul.mubr.f32.vlgmr.msra.gmra.mrb[0].mxu1 %v156_v41 }
 0x1fb   :  { %v246_v43 = vpop.f32.mrb[0].mxu1 }
 0x1fc   :  { %v247_v44 = vadd.f32 %v300_v42, %v246_v43  ;;  %v370_v45 = vpop.f32.mrb[1].mxu1 }
 0x1fe   :  { %v250_v46 = vadd.f32 %v247_v44, %v149_v35 }
 0x200   :  { %251 = vadd.xlane.f32.xlu0 %v250_v46  ;;  %v253_v47 = vmul.f32 %v250_v46, %v250_v46 }
 0x204   :  { %254 = vadd.xlane.f32.xlu0 %v253_v47 }
 0x28d   :  { %v252_v48 = vpop.xlane.xlu0 %251 }
 0x28e   :  { %v256_v49 = vmul.f32 0.0078125, %v252_v48 }
 0x290   :  { %v258_v51 = vmul.f32 %v256_v49, %v256_v49  ;;  %v261_v56 = vsub.f32 %v250_v46, %v256_v49 }
 0x291   :  { %v255_v50 = vpop.xlane.xlu0 %254 }
 0x292   :  { %v257_v52 = vmul.f32 0.0078125, %v255_v50 }
 0x294   :  { %v259_v53 = vsub.f32 %v257_v52, %v258_v51 }
 0x296   :  { %v260_v54 = vmax.f32 %v259_v53, 0.0 }
 0x298   :  { %v262_v55 = vadd.f32 1e-05, %v260_v54 }
 0x29a   :  { %412 = vrsqrt.f32 %v262_v55 }
 0x2a4   :  { %v413_v57 = vpop.eup %412 }
 0x2a5   :  { %v264_v59 = vmul.f32 %v413_v57, %v261_v56 }
 0x2a7   :  { %v272_v61 = vmul.f32 %v301_v58, %v264_v59 }
 0x2a9   :  { %v280_v62 = vadd.f32 %v302_v60, %v272_v61 }
 0x2ab   :  { %281 = vst [vmem:[#allocation8] sm:$0xff] %v280_v62 }
 0x2ac   :  { %491 = shalt.err (!%p488_p0)
}
 0x2ad   :  { %s492_s23 = scalar_lea.hbm %s630_s7, 128 }
 0x2ae   :  { %p493_p1 = scmp.ne.s32.totalorder %s630_s7, %s492_s23  ;;  %p496_p2 = scmp.lt.u32.totalorder %s492_s23, %s630_s7 }
 0x2b0   :  { %p498_p3 = pnand %p496_p2, %p493_p1 }
 0x2b2   :  { %501 = shalt.err (!%p498_p3)
}
 0x2b3   :  { %291 = dma.vmem_to_hbm [thread:$0]  %s289_s20, 128, %s630_s7, [#allocation4]  }
 0x2b4   :  { %506 = dma.done.wait [#allocation4], 128  }
 0x2b5   :  { %507 = vsyncadd [#allocation4], 4294967168 }
 0x2b6   :  { %295 = vsyncpa [#allocation3], 1 }
 0x2b7   :  { %296 = vsyncpa [#allocation6], 1 }
 0x2b8   :  { %297 = vsyncpa [#allocation4], 1 }

</bundles_post_ra>
